<compile_context>
chip_gen: v7x
topology: tpu7x:2x2x1
jax: 0.10.0
libtpu: 0.0.40
codegen_flags: <defaults>
</compile_context>

<pallas_src>
import math
import functools

import jax
import jax.numpy as jnp
from jax.experimental import pallas as pl
from jax.experimental.pallas import tpu as pltpu


def _round_up(v, m):
    return (v + m - 1) // m * m


def _jacobi_theta(i, a, b):
    """Scalar Jacobi recurrence coefficients (pure Python, baked at trace time)."""
    d1 = 2.0 * i * (i + a + b)
    d2 = 2.0 * i + a + b - 2.0
    assert d1 != 0.0 and d2 != 0.0, f"invalid Jacobi (a={a}, b={b}) at degree {i}"
    theta_k = (2 * i + a + b) * (2 * i + a + b - 1) / d1
    theta_k1 = (2 * i + a + b - 1) * (a * a - b * b) / (d1 * d2)
    theta_k2 = (i + a - 1) * (i + b - 1) * (2 * i + a + b) / (i * (i + a + b) * d2)
    return theta_k, theta_k1, theta_k2


def _vmem_cap_bytes():
    """Per-generation scoped-VMEM cap with headroom."""
    try:
        cap = int(pltpu.get_tpu_info().vmem_capacity_bytes)
    except Exception:
        return 48 * 2**20                       # conservative (v7x: 64 MiB physical)
    if cap >= 100 * 2**20:                      # v5e / v6e: 128 MiB physical
        return 100 * 2**20
    return max(16 * 2**20, min(48 * 2**20, cap - 8 * 2**20))


# -----------------------------------------------------------------------------
# Kernel
# -----------------------------------------------------------------------------
def _jacobi_kan_kernel(x_ref, w_ref, lnw_ref, lnb_ref, o_ref, basis_ref, *,
                       spline_order, a, b, din_pad, dout_true):
    # x tile in f32; all elementwise transcendentals stay f32 (v5e-safe).
    x = x_ref[...].astype(jnp.float32)                        # (TB, Din_p)

    # ---- fused operand: [ SiLU(x) | P0 | P1 | ... | P_D ] along lanes --------
    # Written degree-by-degree into a bf16 VMEM scratch (no concatenate copy).
    basis_ref[:, 0:din_pad] = (x * jax.nn.sigmoid(x)).astype(basis_ref.dtype)

    t = jnp.tanh(x)
    p_prev2 = jnp.ones_like(t)                                # P0 = 1
    basis_ref[:, din_pad:2 * din_pad] = p_prev2.astype(basis_ref.dtype)
    p_prev1 = None
    if spline_order >= 1:
        p_prev1 = 0.5 * ((a - b) + (a + b + 2.0) * t)          # P1
        basis_ref[:, 2 * din_pad:3 * din_pad] = p_prev1.astype(basis_ref.dtype)
    for i in range(2, spline_order + 1):
        tk, tk1, tk2 = _jacobi_theta(i, a, b)                  # Python scalars
        p_cur = (tk * t + tk1) * p_prev1 - tk2 * p_prev2
        basis_ref[:, (i + 1) * din_pad:(i + 2) * din_pad] = p_cur.astype(basis_ref.dtype)
        p_prev2, p_prev1 = p_prev1, p_cur

    # ---- ONE MXU matmul: bf16 x bf16 -> f32 accumulation ---------------------
    # K = (spline_order + 2) * Din_p ; covers base branch + all spline degrees.
    acc = jnp.dot(basis_ref[...], w_ref[...], preferred_element_type=jnp.float32)

    # ---- LayerNorm over the TRUE out_features (eps = 1e-5) -------------------
    # INVARIANT: padded columns/rows of the packed weights (and LN params) are
    # exactly zero, so padded output columns of `acc` are exactly zero and the
    # two sums below already only see the true Dout columns.
    inv_n = 1.0 / float(dout_true)
    s1 = jnp.sum(acc, axis=-1, keepdims=True)
    s2 = jnp.sum(acc * acc, axis=-1, keepdims=True)            # independent XLU reductions
    mean = s1 * inv_n
    var = s2 * inv_n - mean * mean
    yn = (acc - mean) * jax.lax.rsqrt(var + 1e-5)
    yn = yn * lnw_ref[...] + lnb_ref[...]

    # ---- output activation: SiLU ---------------------------------------------
    o_ref[...] = (yn * jax.nn.sigmoid(yn)).astype(o_ref.dtype)


# -----------------------------------------------------------------------------
# One-time weight packing (hoisted out of the per-call path)
# -----------------------------------------------------------------------------
def pack_jacobi_kan_params(params, *, spline_order):
    base_w = jnp.asarray(params["base_weights"], jnp.float32)   # (out, in)
    coeff = jnp.asarray(params["jacobi_coeff"], jnp.float32)    # (in, out, D+1)
    dout, din = base_w.shape
    nd = spline_order + 1
    din_p = _round_up(din, 128)
    dout_p = _round_up(dout, 128)
    kp = (nd + 1) * din_p

    # Packed weight slab, lane-group layout matching the kernel's basis:
    #   rows [0, Din_p)              -> base weights (transposed)
    #   rows [(d+1)*Din_p + i]       -> coeff[i, :, d]
    # Padded rows/cols MUST stay exactly zero (LN-statistics invariant);
    # 0.0 is exactly representable in bf16 so the cast preserves it.
    w = jnp.zeros((nd + 1, din_p, dout_p), jnp.float32)
    w = w.at[0, :din, :dout].set(base_w.T)
    w = w.at[1:, :din, :dout].set(jnp.transpose(coeff, (2, 0, 1)))
    w_packed = w.reshape(kp, dout_p).astype(jnp.bfloat16)

    lnw = jnp.zeros((1, dout_p), jnp.float32).at[0, :dout].set(params["ln_weight"])
    lnb = jnp.zeros((1, dout_p), jnp.float32).at[0, :dout].set(params["ln_bias"])
    return dict(w_packed=w_packed, ln_w=lnw, ln_b=lnb,
                din=din, dout=dout, din_p=din_p, dout_p=dout_p,
                spline_order=spline_order)


# -----------------------------------------------------------------------------
# Forward wrapper
# -----------------------------------------------------------------------------
def jacobi_kan_forward(x, packed, *, a=1.0, b=1.0, block_batch=512,
                       interpret=False):
    din, dout = packed["din"], packed["dout"]
    din_p, dout_p = packed["din_p"], packed["dout_p"]
    spline_order = packed["spline_order"]
    nd = spline_order + 1
    kp = (nd + 1) * din_p

    x2 = x.reshape(-1, din)
    bsz = x2.shape[0]

    # Batch tiling: big tiles to amortize per-step overhead, but keep >= 2 grid
    # steps when the batch allows so both v7x TensorCores get work.
    min_tile = 16 if x2.dtype.itemsize == 2 else 8
    b8 = _round_up(bsz, min_tile)
    tb = _round_up(min(block_batch, b8), min_tile)
    if b8 // tb < 2 and b8 >= 2 * min_tile:
        tb = _round_up((b8 + 1) // 2, min_tile)
    b_p = _round_up(b8, tb)

    x_p = jnp.zeros((b_p, din_p), x2.dtype).at[:bsz, :din].set(x2)

    kernel = functools.partial(
        _jacobi_kan_kernel, spline_order=spline_order,
        a=float(a), b=float(b), din_pad=din_p, dout_true=dout)

    # ---- VMEM budget from actual buffer sizes --------------------------------
    x_bytes = x_p.dtype.itemsize
    o_bytes = x.dtype.itemsize
    vmem_bytes = (2 * tb * din_p * x_bytes          # x tile (double-buffered)
                  + 2 * tb * dout_p * o_bytes       # out tile (double-buffered)
                  + kp * dout_p * 2                 # bf16 weight slab (single-buffered)
                  + 4 * dout_p * 4                  # LN scale / bias
                  + tb * kp * 2                     # bf16 basis scratch
                  + 4 * tb * dout_p * 4             # f32 acc + LN temps
                  + 4 * tb * din_p * 4)             # f32 x / tanh / poly temps
    vmem_limit = int(min(_vmem_cap_bytes(), max(32 * 2**20, 2 * vmem_bytes)))

    flops = 2 * b_p * kp * dout_p
    transcendentals = b_p * (2 * din_p + dout_p)
    bytes_accessed = (b_p * din_p * x_bytes + kp * dout_p * 2
                      + 8 * dout_p + b_p * dout_p * o_bytes)

    out = pl.pallas_call(
        kernel,
        out_shape=jax.ShapeDtypeStruct((b_p, dout_p), x.dtype),
        grid=(b_p // tb,),
        in_specs=[
            pl.BlockSpec((tb, din_p), lambda i: (i, 0)),                 # x tile
            pl.BlockSpec((kp, dout_p), lambda i: (0, 0),                 # fused weights
                         pipeline_mode=pl.Buffered(1)),
            pl.BlockSpec((1, dout_p), lambda i: (0, 0),                  # LN weight
                         pipeline_mode=pl.Buffered(1)),
            pl.BlockSpec((1, dout_p), lambda i: (0, 0),                  # LN bias
                         pipeline_mode=pl.Buffered(1)),
        ],
        out_specs=pl.BlockSpec((tb, dout_p), lambda i: (i, 0)),
        scratch_shapes=[pltpu.VMEM((tb, kp), jnp.bfloat16)],             # fused basis
        compiler_params=pltpu.CompilerParams(
            dimension_semantics=("parallel",),
            vmem_limit_bytes=vmem_limit),
        cost_estimate=pl.CostEstimate(flops=flops,
                                      transcendentals=transcendentals,
                                      bytes_accessed=bytes_accessed),
        interpret=interpret,
    )(x_p, packed["w_packed"], packed["ln_w"], packed["ln_b"])
    # TODO(synk): for very large (spline_order+2)*Din*Dout the resident weight
    # slab exceeds v7x's 64 MiB VMEM; tile K with a reduction grid axis (f32
    # VMEM accumulator + pl.when(k == last) LayerNorm/SiLU epilogue), NOT a
    # Dout split (which would break the full-width LayerNorm).

    return out[:bsz, :dout]


# -----------------------------------------------------------------------------
# Parameter init (mirrors the PyTorch __init__) and pure-JAX reference
# -----------------------------------------------------------------------------
def init_jacobi_kan_params(key, in_features, out_features, spline_order,
                           a=1.0, b=1.0):
    k1, k2 = jax.random.split(key)
    bound = math.sqrt(6.0 / (in_features + out_features))      # xavier_uniform
    base_weights = jax.random.uniform(k1, (out_features, in_features),
                                      jnp.float32, -bound, bound)
    std = 1.0 / (in_features * (spline_order + 1))
    jacobi_coeff = std * jax.random.normal(
        k2, (in_features, out_features, spline_order + 1), jnp.float32)
    return dict(base_weights=base_weights,
                jacobi_coeff=jacobi_coeff,
                ln_weight=jnp.ones((out_features,), jnp.float32),
                ln_bias=jnp.zeros((out_features,), jnp.float32))


def jacobi_kan_reference(x, params, *, spline_order, a=1.0, b=1.0):
    """Pure-JAX mirror of the PyTorch forward (f32, HIGHEST precision)."""
    base_w = params["base_weights"]
    din = base_w.shape[1]
    x = x.reshape(-1, din)
    hi = jax.lax.Precision.HIGHEST

    basis = jnp.dot(x * jax.nn.sigmoid(x), base_w.T, precision=hi)   # SiLU base
    t = jnp.tanh(x)
    polys = [jnp.ones_like(t)]
    if spline_order >= 1:
        polys.append(0.5 * ((a - b) + (a + b + 2.0) * t))
    for i in range(2, spline_order + 1):
        tk, tk1, tk2 = _jacobi_theta(i, float(a), float(b))
        polys.append((tk * t + tk1) * polys[i - 1] - tk2 * polys[i - 2])
    jacobi = jnp.stack(polys, axis=-1)                               # (B, in, D+1)
    y = jnp.einsum('bid,iod->bo', jacobi, params["jacobi_coeff"], precision=hi)
    y = y + basis
    mean = y.mean(-1, keepdims=True)
    var = ((y - mean) ** 2).mean(-1, keepdims=True)
    yn = (y - mean) / jnp.sqrt(var + 1e-5)
    yn = yn * params["ln_weight"] + params["ln_bias"]
    return yn * jax.nn.sigmoid(yn)


if __name__ == "__main__":
    key = jax.random.PRNGKey(0)

    configs = [
        dict(B=8, IN_F=32, OUT_F=32, ORDER=3, A=1.0, Bj=1.0),
        dict(B=37, IN_F=20, OUT_F=49, ORDER=2, A=1.5, Bj=0.5),   # exercises padding
    ]
    for ci, cfg in enumerate(configs):
        kx, kparam, key = jax.random.split(key, 3)
        x = jax.random.normal(kx, (cfg["B"], cfg["IN_F"]), dtype=jnp.float32)
        params = init_jacobi_kan_params(kparam, cfg["IN_F"], cfg["OUT_F"],
                                        cfg["ORDER"], cfg["A"], cfg["Bj"])
        packed = pack_jacobi_kan_params(params, spline_order=cfg["ORDER"])

        out = jacobi_kan_forward(x, packed, a=cfg["A"], b=cfg["Bj"])
        out = jax.block_until_ready(out)

        ref = jacobi_kan_reference(x, params, spline_order=cfg["ORDER"],
                                   a=cfg["A"], b=cfg["Bj"])
        assert out.shape == (cfg["B"], cfg["OUT_F"]), (ci, out.shape)
        max_err = float(jnp.max(jnp.abs(out - ref)))
        # bf16 matmul operands with f32 accumulation vs f32-HIGHEST reference.
        assert jnp.allclose(out, ref, atol=2e-2, rtol=2e-2), \
            f"cfg {ci}: max err {max_err}"

    print("KERNEL_OK")
</pallas_src>

<mosaic_0001>
module attributes {stable_mosaic.version = 11 : i64} {
  func.func @_jacobi_kan_kernel(%arg0: i32, %arg1: memref<8x128xf32, #tpu.memory_space<vmem>>, %arg2: memref<640x128xbf16, #tpu.memory_space<vmem>>, %arg3: memref<1x128xf32, #tpu.memory_space<vmem>>, %arg4: memref<1x128xf32, #tpu.memory_space<vmem>>, %arg5: memref<8x128xf32, #tpu.memory_space<vmem>>, %arg6: memref<8x640xbf16, #tpu.memory_space<vmem>>) attributes {dimension_semantics = [#tpu.dimension_semantics<parallel>], iteration_bounds = array<i64: 1>, scalar_prefetch = 0 : i64, scratch_operands = 1 : i64, tpu.core_type = #tpu.core_type<tc>, window_params = [{transform_indices = @transform_0, window_bounds = array<i64: 8, 128>}, {pipeline_mode = #tpu.pipeline_mode<synchronous>, transform_indices = @transform_1, window_bounds = array<i64: 640, 128>}, {pipeline_mode = #tpu.pipeline_mode<synchronous>, transform_indices = @transform_2, window_bounds = array<i64: 1, 128>}, {pipeline_mode = #tpu.pipeline_mode<synchronous>, transform_indices = @transform_3, window_bounds = array<i64: 1, 128>}, {transform_indices = @transform_4, window_bounds = array<i64: 8, 128>}]} {
    %c0 = arith.constant 0 : index
    %c0_0 = arith.constant 0 : index
    %0 = vector.load %arg1[%c0, %c0_0] : memref<8x128xf32, #tpu.memory_space<vmem>>, vector<8x128xf32>
    %1 = arith.negf %0 : vector<8x128xf32>
    %2 = math.exp %1 : vector<8x128xf32>
    %cst = arith.constant 1.000000e+00 : f32
    %3 = vector.broadcast %cst : f32 to vector<8x128xf32>
    %4 = arith.addf %3, %2 : vector<8x128xf32>
    %5 = arith.divf %3, %4 : vector<8x128xf32>
    %6 = arith.mulf %0, %5 : vector<8x128xf32>
    %7 = arith.truncf %6 : vector<8x128xf32> to vector<8x128xbf16>
    %c0_1 = arith.constant 0 : index
    %c0_2 = arith.constant 0 : index
    %8 = vector.load %arg6[%c0_1, %c0_2] : memref<8x640xbf16, #tpu.memory_space<vmem>>, vector<8x128xbf16>
    tpu.vector_store %arg6[%c0_1, %c0_2], %7 {strides = array<i32>} : memref<8x640xbf16, #tpu.memory_space<vmem>>, vector<8x128xbf16>,
    %9 = math.tanh %0 : vector<8x128xf32>
    %cst_3 = arith.constant 1.000000e+00 : f32
    %10 = vector.broadcast %cst_3 : f32 to vector<8x128xf32>
    %11 = arith.truncf %10 : vector<8x128xf32> to vector<8x128xbf16>
    %c0_4 = arith.constant 0 : index
    %c128 = arith.constant 128 : index
    %12 = vector.load %arg6[%c0_4, %c128] : memref<8x640xbf16, #tpu.memory_space<vmem>>, vector<8x128xbf16>
    tpu.vector_store %arg6[%c0_4, %c128], %11 {strides = array<i32>} : memref<8x640xbf16, #tpu.memory_space<vmem>>, vector<8x128xbf16>,
    %cst_5 = arith.constant 4.000000e+00 : f32
    %13 = vector.broadcast %cst_5 : f32 to vector<8x128xf32>
    %14 = arith.mulf %13, %9 : vector<8x128xf32>
    %cst_6 = arith.constant 0.000000e+00 : f32
    %15 = vector.broadcast %cst_6 : f32 to vector<8x128xf32>
    %16 = arith.addf %15, %14 : vector<8x128xf32>
    %cst_7 = arith.constant 5.000000e-01 : f32
    %17 = vector.broadcast %cst_7 : f32 to vector<8x128xf32>
    %18 = arith.mulf %17, %16 : vector<8x128xf32>
    %19 = arith.truncf %18 : vector<8x128xf32> to vector<8x128xbf16>
    %c0_8 = arith.constant 0 : index
    %c256 = arith.constant 256 : index
    %20 = vector.load %arg6[%c0_8, %c256] : memref<8x640xbf16, #tpu.memory_space<vmem>>, vector<8x128xbf16>
    tpu.vector_store %arg6[%c0_8, %c256], %19 {strides = array<i32>} : memref<8x640xbf16, #tpu.memory_space<vmem>>, vector<8x128xbf16>,
    %cst_9 = arith.constant 1.875000e+00 : f32
    %21 = vector.broadcast %cst_9 : f32 to vector<8x128xf32>
    %22 = arith.mulf %21, %9 : vector<8x128xf32>
    %cst_10 = arith.constant 0.000000e+00 : f32
    %23 = vector.broadcast %cst_10 : f32 to vector<8x128xf32>
    %24 = arith.addf %22, %23 : vector<8x128xf32>
    %25 = arith.mulf %24, %18 : vector<8x128xf32>
    %cst_11 = arith.constant 7.500000e-01 : f32
    %26 = vector.broadcast %cst_11 : f32 to vector<8x128xf32>
    %27 = arith.mulf %26, %10 : vector<8x128xf32>
    %28 = arith.subf %25, %27 : vector<8x128xf32>
    %29 = arith.truncf %28 : vector<8x128xf32> to vector<8x128xbf16>
    %c0_12 = arith.constant 0 : index
    %c384 = arith.constant 384 : index
    %30 = vector.load %arg6[%c0_12, %c384] : memref<8x640xbf16, #tpu.memory_space<vmem>>, vector<8x128xbf16>
    tpu.vector_store %arg6[%c0_12, %c384], %29 {strides = array<i32>} : memref<8x640xbf16, #tpu.memory_space<vmem>>, vector<8x128xbf16>,
    %cst_13 = arith.constant 1.86666667 : f32
    %31 = vector.broadcast %cst_13 : f32 to vector<8x128xf32>
    %32 = arith.mulf %31, %9 : vector<8x128xf32>
    %cst_14 = arith.constant 0.000000e+00 : f32
    %33 = vector.broadcast %cst_14 : f32 to vector<8x128xf32>
    %34 = arith.addf %32, %33 : vector<8x128xf32>
    %35 = arith.mulf %34, %28 : vector<8x128xf32>
    %cst_15 = arith.constant 8.000000e-01 : f32
    %36 = vector.broadcast %cst_15 : f32 to vector<8x128xf32>
    %37 = arith.mulf %36, %18 : vector<8x128xf32>
    %38 = arith.subf %35, %37 : vector<8x128xf32>
    %39 = arith.truncf %38 : vector<8x128xf32> to vector<8x128xbf16>
    %c0_16 = arith.constant 0 : index
    %c512 = arith.constant 512 : index
    %40 = vector.load %arg6[%c0_16, %c512] : memref<8x640xbf16, #tpu.memory_space<vmem>>, vector<8x128xbf16>
    tpu.vector_store %arg6[%c0_16, %c512], %39 {strides = array<i32>} : memref<8x640xbf16, #tpu.memory_space<vmem>>, vector<8x128xbf16>,
    %c0_17 = arith.constant 0 : index
    %c0_18 = arith.constant 0 : index
    %41 = vector.load %arg6[%c0_17, %c0_18] : memref<8x640xbf16, #tpu.memory_space<vmem>>, vector<8x640xbf16>
    %c0_19 = arith.constant 0 : index
    %c0_20 = arith.constant 0 : index
    %42 = vector.load %arg2[%c0_19, %c0_20] : memref<640x128xbf16, #tpu.memory_space<vmem>>, vector<640x128xbf16>
    %cst_21 = arith.constant dense<0.000000e+00> : vector<8x128xf32>
    %43 = tpu.matmul %41, %42, %cst_21 {dimension_numbers = #tpu.dot_dimension_numbers<[1], [0], [0], [1], [0, 0, 1, 1], [], []>} : vector<8x640xbf16>, vector<640x128xbf16>, vector<8x128xf32> -> vector<8x128xf32>
    %cst_22 = arith.constant dense<0.000000e+00> : vector<8xf32>
    %44 = vector.multi_reduction <add>, %43, %cst_22 [1] : vector<8x128xf32> to vector<8xf32>
    %45 = vector.shape_cast %44 : vector<8xf32> to vector<8x1xf32>
    %46 = arith.mulf %43, %43 : vector<8x128xf32>
    %cst_23 = arith.constant dense<0.000000e+00> : vector<8xf32>
    %47 = vector.multi_reduction <add>, %46, %cst_23 [1] : vector<8x128xf32> to vector<8xf32>
    %48 = vector.shape_cast %47 : vector<8xf32> to vector<8x1xf32>
    %cst_24 = arith.constant 3.125000e-02 : f32
    %49 = vector.broadcast %cst_24 : f32 to vector<8x1xf32>
    %50 = arith.mulf %45, %49 : vector<8x1xf32>
    %cst_25 = arith.constant 3.125000e-02 : f32
    %51 = vector.broadcast %cst_25 : f32 to vector<8x1xf32>
    %52 = arith.mulf %48, %51 : vector<8x1xf32>
    %53 = arith.mulf %50, %50 : vector<8x1xf32>
    %54 = arith.subf %52, %53 : vector<8x1xf32>
    %55 = vector.broadcast %50 : vector<8x1xf32> to vector<8x128xf32>
    %56 = arith.subf %43, %55 : vector<8x128xf32>
    %cst_26 = arith.constant 9.99999974E-6 : f32
    %57 = vector.broadcast %cst_26 : f32 to vector<8x1xf32>
    %58 = arith.addf %54, %57 : vector<8x1xf32>
    %59 = math.rsqrt %58 : vector<8x1xf32>
    %60 = vector.broadcast %59 : vector<8x1xf32> to vector<8x128xf32>
    %61 = arith.mulf %56, %60 : vector<8x128xf32>
    %c0_27 = arith.constant 0 : index
    %c0_28 = arith.constant 0 : index
    %62 = vector.load %arg3[%c0_27, %c0_28] : memref<1x128xf32, #tpu.memory_space<vmem>>, vector<1x128xf32>
    %63 = vector.broadcast %62 : vector<1x128xf32> to vector<8x128xf32>
    %64 = arith.mulf %61, %63 : vector<8x128xf32>
    %c0_29 = arith.constant 0 : index
    %c0_30 = arith.constant 0 : index
    %65 = vector.load %arg4[%c0_29, %c0_30] : memref<1x128xf32, #tpu.memory_space<vmem>>, vector<1x128xf32>
    %66 = vector.broadcast %65 : vector<1x128xf32> to vector<8x128xf32>
    %67 = arith.addf %64, %66 : vector<8x128xf32>
    %68 = arith.negf %67 : vector<8x128xf32>
    %69 = math.exp %68 : vector<8x128xf32>
    %cst_31 = arith.constant 1.000000e+00 : f32
    %70 = vector.broadcast %cst_31 : f32 to vector<8x128xf32>
    %71 = arith.addf %70, %69 : vector<8x128xf32>
    %72 = arith.divf %70, %71 : vector<8x128xf32>
    %73 = arith.mulf %67, %72 : vector<8x128xf32>
    %c0_32 = arith.constant 0 : index
    %c0_33 = arith.constant 0 : index
    %74 = vector.load %arg5[%c0_32, %c0_33] : memref<8x128xf32, #tpu.memory_space<vmem>>, vector<8x128xf32>
    tpu.vector_store %arg5[%c0_32, %c0_33], %73 {strides = array<i32>} : memref<8x128xf32, #tpu.memory_space<vmem>>, vector<8x128xf32>,
    return
  }
  func.func @transform_0(%arg0: i32) -> (i32, i32) {
    %c0_i32 = arith.constant 0 : i32
    %c0_i32_0 = arith.constant 0 : i32
    return %arg0, %c0_i32 : i32, i32
  }
  func.func @transform_1(%arg0: i32) -> (i32, i32) {
    %c0_i32 = arith.constant 0 : i32
    %c0_i32_0 = arith.constant 0 : i32
    %c0_i32_1 = arith.constant 0 : i32
    return %c0_i32, %c0_i32_0 : i32, i32
  }
  func.func @transform_2(%arg0: i32) -> (i32, i32) {
    %c0_i32 = arith.constant 0 : i32
    %c0_i32_0 = arith.constant 0 : i32
    %c0_i32_1 = arith.constant 0 : i32
    return %c0_i32, %c0_i32_0 : i32, i32
  }
  func.func @transform_3(%arg0: i32) -> (i32, i32) {
    %c0_i32 = arith.constant 0 : i32
    %c0_i32_0 = arith.constant 0 : i32
    %c0_i32_1 = arith.constant 0 : i32
    return %c0_i32, %c0_i32_0 : i32, i32
  }
  func.func @transform_4(%arg0: i32) -> (i32, i32) {
    %c0_i32 = arith.constant 0 : i32
    %c0_i32_0 = arith.constant 0 : i32
    return %arg0, %c0_i32 : i32, i32
  }
}

</mosaic_0001>

<bundles_post_ra>
// kernel: tpu_custom_call.1
= control target key start
LH: loop header
LB: loop body
LE: loop exit
PB: predicated region body
PF: predicated region fallthrough
CT: control target
= control target key end

     0   :  { %9 = vsyncpa [#allocation4], 0  ;;  %s932_s0 = inlined_call_operand.hbm [shape: f32[8,128], index: 0, kind: input, shape index: {}]   ;;  %s933_s1 = inlined_call_operand.hbm [shape: bf16[640,128], index: 1, kind: input, shape index: {}]   ;;  %s934_s2 = inlined_call_operand.vmem [shape: f32[1,128], index: 2, kind: input, shape index: {}]   ;;  %s935_s3 = inlined_call_operand.vmem [shape: f32[1,128], index: 3, kind: input, shape index: {}]   ;;  %s936_s4 = inlined_call_operand.hbm [shape: f32[8,128], index: 4, kind: output, shape index: {}]  }
   0x1   :  { %10 = vsyncpa [#allocation7], 0 }
   0x2   :  { %11 = vsyncpa [#allocation5], 0  ;;  %s850_s15 = smov [#allocation3]   ;;  %s851_s17 = smov [#allocation6]  }
   0x3   :  { %s18_s16 = sshll.u32 %s850_s15, 4  ;;  %s27_s18 = sshll.u32 %s851_s17, 4  ;;  %s19_s16 = int_to_ptr.vmem [resolvable:$true] %s18_s16  ;;  %s883_s18 = int_to_ptr.vmem [resolvable:$true] %s27_s18 }
   0x4   :  { %s778_s21 = scalar_lea.hbm %s932_s0, 128 }
   0x5   :  { %p779_p0 = scmp.ne.s32.totalorder %s932_s0, %s778_s21  ;;  %p782_p1 = scmp.lt.u32.totalorder %s778_s21, %s932_s0 }
   0x7   :  { %p784_p2 = pnand %p782_p1, %p779_p0 }
   0x9   :  { %787 = shalt.err (!%p784_p2)
}
   0xa   :  { %s788_s26 = scalar_lea.vmem %s19_s16, 128  ;;  %p793_p4 = scmp.lt.s32.totalorder %s19_s16, %s19_s16 }
   0xb   :  { %p789_p3 = scmp.ne.s32.totalorder %s19_s16, %s788_s26  ;;  %p794_p5 = scmp.lt.s32.totalorder %s788_s26, %s788_s26 }
   0xd   :  { %p795_p6 = por %p794_p5, %p793_p4 }
   0xf   :  { %p796_p7 = pnand %p795_p6, %p789_p3 }
  0x11   :  { %799 = shalt.err (!%p796_p7)
}
  0x12   :  { %21 = dma.hbm_to_vmem [thread:$0]  %s932_s0, 128, %s19_s16, [#allocation4]  }
  0x13   :  { %s800_s5 = scalar_lea.hbm %s933_s1, 5120 }
  0x14   :  { %p801_p8 = scmp.ne.s32.totalorder %s933_s1, %s800_s5  ;;  %p804_p9 = scmp.lt.u32.totalorder %s800_s5, %s933_s1 }
  0x16   :  { %p806_p10 = pnand %p804_p9, %p801_p8 }
  0x18   :  { %809 = shalt.err (!%p806_p10)
}
  0x19   :  { %s810_s10 = scalar_lea.vmem %s883_s18, 5120  ;;  %p815_p12 = scmp.lt.s32.totalorder %s883_s18, %s883_s18 }
  0x1a   :  { %p811_p11 = scmp.ne.s32.totalorder %s883_s18, %s810_s10  ;;  %p816_p13 = scmp.lt.s32.totalorder %s810_s10, %s810_s10 }
  0x1c   :  { %p817_p0 = por %p816_p13, %p815_p12 }
  0x1e   :  { %p818_p1 = pnand %p817_p0, %p811_p11 }
  0x20   :  { %821 = shalt.err (!%p818_p1)
}
  0x21   :  { %s852_s0 = smov 64   ;;  %s853_s11 = smov 4  }
  0x22   :  { %33 = dma.hbm_to_vmem [thread:$0]  %s933_s1, 5120, %s883_s18, [#allocation7], %s852_s0, %s852_s0, %s853_s11  }
  0x23   :  { %844 = dma.done.wait [#allocation4], 128  }
  0x24   :  { %845 = vsyncadd [#allocation4], 4294967168 }
  0x25   :  { %846 = dma.done.wait [#allocation7], 5120  }
  0x26   :  { %847 = vsyncadd [#allocation7], 4294962176  ;;  %v854_v0 = vmov 1065369472   ;;  %v721_v1 = vld [vmem:[#allocation6 + $0x40] sm:$0xff]   ;;  %v725_v5 = vld [vmem:[#allocation6 + $0x48] sm:$0xff]  }
  0x27   :  { %57 = vst [vmem:[#allocation2 + $0x4] sm:$0xf] %v854_v0  ;;  %v722_v2 = vld [vmem:[#allocation6] sm:$0xff]   ;;  %640 = vmatprep.subr.bf16.mxu0 %v721_v1  ;;  %v726_v6 = vld [vmem:[#allocation6 + $0x8] sm:$0xff]   ;;  %v729_v9 = vld [vmem:[#allocation6 + $0x50] sm:$0xff]   ;;  %v855_v34 = vmov 0.0  }
  0x28   :  { %v723_v3 = vld [vmem:[#allocation6 + $0xc0] sm:$0xff]   ;;  %641 = vmatpush3.bf16.msra.mxu0 %v722_v2  ;;  %v727_v7 = vld [vmem:[#allocation6 + $0xc8] sm:$0xff]   ;;  %v730_v10 = vld [vmem:[#allocation6 + $0x10] sm:$0xff]   ;;  %vm856_vm0 = vmmov 0   ;;  %s857_s17 = smov [#allocation8]  }
  0x29   :  { %v724_v4 = vld [vmem:[#allocation6 + $0x80] sm:$0xff]   ;;  %662 = vmatprep.subr.bf16.mxu1 %v723_v3  ;;  %642 = vmatprep.subr.bf16.mxu0 %v725_v5  ;;  %v728_v8 = vld [vmem:[#allocation6 + $0x88] sm:$0xff]   ;;  %v731_v11 = vld [vmem:[#allocation6 + $0xd0] sm:$0xff]   ;;  %s580_s18 = sshll.u32 %s857_s17, 4  ;;  %s581_s18 = int_to_ptr.vmem [resolvable:$true] %s580_s18 }
  0x2a   :  { %663 = vmatpush3.bf16.msra.mxu1 %v724_v4  ;;  %v732_v12 = vld [vmem:[#allocation6 + $0x90] sm:$0xff]   ;;  %v733_v13 = vld [vmem:[#allocation6 + $0x58] sm:$0xff]   ;;  %v737_v17 = vld [vmem:[#allocation6 + $0x60] sm:$0xff]   ;;  %s822_s19 = scalar_lea.vmem %s581_s18, 128  ;;  %p827_p3 = scmp.lt.s32.totalorder %s581_s18, %s581_s18 }
  0x2b   :  { %664 = vmatprep.subr.bf16.mxu1 %v727_v7  ;;  %v734_v14 = vld [vmem:[#allocation6 + $0x18] sm:$0xff]   ;;  %v738_v18 = vld [vmem:[#allocation6 + $0x20] sm:$0xff]   ;;  %v741_v21 = vld [vmem:[#allocation6 + $0x68] sm:$0xff]   ;;  %p823_p2 = scmp.ne.s32.totalorder %s581_s18, %s822_s19  ;;  %p828_p4 = scmp.lt.s32.totalorder %s822_s19, %s822_s19 }
  0x2c   :  { %643 = vmatpush3.bf16.msra.mxu0 %v726_v6  ;;  %v735_v15 = vld [vmem:[#allocation6 + $0xd8] sm:$0xff]   ;;  %v739_v19 = vld [vmem:[#allocation6 + $0xe0] sm:$0xff]   ;;  %v742_v22 = vld [vmem:[#allocation6 + $0x28] sm:$0xff]  }
  0x2d   :  { %644 = vmatprep.subr.bf16.mxu0 %v729_v9  ;;  %v736_v16 = vld [vmem:[#allocation6 + $0x98] sm:$0xff]   ;;  %v740_v20 = vld [vmem:[#allocation6 + $0xa0] sm:$0xff]   ;;  %v743_v23 = vld [vmem:[#allocation6 + $0xe8] sm:$0xff]   ;;  %p829_p5 = por %p828_p4, %p827_p3 }
  0x2e   :  { %665 = vmatpush3.bf16.msra.mxu1 %v728_v8  ;;  %v744_v24 = vld [vmem:[#allocation6 + $0xa8] sm:$0xff]   ;;  %v745_v25 = vld [vmem:[#allocation6 + $0x70] sm:$0xff]   ;;  %v749_v29 = vld [vmem:[#allocation6 + $0x78] sm:$0xff]  }
  0x2f   :  { %666 = vmatprep.subr.bf16.mxu1 %v731_v11  ;;  %v746_v26 = vld [vmem:[#allocation6 + $0x30] sm:$0xff]   ;;  %v750_v30 = vld [vmem:[#allocation6 + $0x38] sm:$0xff]   ;;  %v757_v60 = vld [vmem:[#allocation6 + $0x100] sm:$0xff]   ;;  %p830_p6 = pnand %p829_p5, %p823_p2 }
  0x30   :  { %645 = vmatpush3.bf16.msra.mxu0 %v730_v10  ;;  %v747_v27 = vld [vmem:[#allocation6 + $0xf0] sm:$0xff]   ;;  %v751_v31 = vld [vmem:[#allocation6 + $0xf8] sm:$0xff]   ;;  %v758_v61 = vld [vmem:[#allocation6 + $0x108] sm:$0xff]  }
  0x31   :  { %646 = vmatprep.subr.bf16.mxu0 %v733_v13  ;;  %v748_v28 = vld [vmem:[#allocation6 + $0xb0] sm:$0xff]   ;;  %v752_v32 = vld [vmem:[#allocation6 + $0xb8] sm:$0xff]   ;;  %v761_v0 = vld [vmem:[#allocation6 + $0x120] sm:$0xff]  }
  0x32   :  { %667 = vmatpush3.bf16.msra.mxu1 %v732_v12  ;;  %v46_v33 = vld [vmem:[#allocation3] sm:$0xff]  ;;  %v759_v62 = vld [vmem:[#allocation6 + $0x110] sm:$0xff]   ;;  %v762_v1 = vld [vmem:[#allocation6 + $0x128] sm:$0xff]  }
  0x33   :  { %668 = vmatprep.subr.bf16.mxu1 %v735_v15  ;;  %v590_v35 = vmul.f32 -1.442695, %v46_v33  ;;  %766 = vtanh.f32 %v46_v33  ;;  %v760_v63 = vld [vmem:[#allocation6 + $0x118] sm:$0xff]   ;;  %v763_v2 = vld [vmem:[#allocation6 + $0x130] sm:$0xff]  }
  0x34   :  { %647 = vmatpush3.bf16.msra.mxu0 %v734_v14  ;;  %v764_v3 = vld [vmem:[#allocation6 + $0x138] sm:$0xff]  }
  0x35   :  { %648 = vmatprep.subr.bf16.mxu0 %v737_v17  ;;  %768 = vpow2.f32 %v590_v35 }
  0x36   :  { %669 = vmatpush3.bf16.msra.mxu1 %v736_v16 }
  0x37   :  { %670 = vmatprep.subr.bf16.mxu1 %v739_v19 }
  0x38   :  { %649 = vmatpush3.bf16.msra.mxu0 %v738_v18 }
  0x39   :  { %650 = vmatprep.subr.bf16.mxu0 %v741_v21 }
  0x3a   :  { %671 = vmatpush3.bf16.msra.mxu1 %v740_v20 }
  0x3b   :  { %672 = vmatprep.subr.bf16.mxu1 %v743_v23 }
  0x3c   :  { %651 = vmatpush3.bf16.msra.mxu0 %v742_v22 }
  0x3d   :  { %652 = vmatprep.subr.bf16.mxu0 %v745_v25  ;;  %v767_v36 = vpop.eup %766 }
  0x3e   :  { %673 = vmatpush3.bf16.msra.mxu1 %v744_v24  ;;  %v58_v37 = vmul.f32 4.0, %v767_v36  ;;  %v63_v38 = vmul.f32 1.875, %v767_v36  ;;  %v69_v44 = vmul.f32 1.8666667, %v767_v36 }
  0x3f   :  { %674 = vmatprep.subr.bf16.mxu1 %v747_v27  ;;  %v769_v39 = vpop.eup %768 }
  0x40   :  { %653 = vmatpush3.bf16.msra.mxu0 %v746_v26  ;;  %v50_v40 = vadd.f32 1.0, %v769_v39  ;;  %v60_v41 = vmul.f32 0.5, %v58_v37 }
  0x41   :  { %654 = vmatprep.subr.bf16.mxu0 %v749_v29 }
  0x42   :  { %675 = vmatpush3.bf16.msra.mxu1 %v748_v28  ;;  %770 = vrcp.f32 %v50_v40  ;;  %v61_v42 = vpack.c.bf16 %v60_v41, %v60_v41  ;;  %v65_v43 = vmul.f32 %v63_v38, %v60_v41  ;;  %v72_v46 = vmul.f32 0.8, %v60_v41 }
  0x43   :  { %676 = vmatprep.subr.bf16.mxu1 %v751_v31  ;;  %v637_v31 = vld [vmem:[%s934_s2] ss:$0 sm:$0xff] }
  0x44   :  { %655 = vmatpush3.bf16.msra.mxu0 %v750_v30  ;;  %62 = vst [vmem:[#allocation2 + $0x8] sm:$0xf] %v61_v42  ;;  %v591_v45 = vadd.f32 -0.75, %v65_v43 }
  0x45   :  { %693 = vmatprep.subr.bf16.mxu0 %v855_v34 }
  0x46   :  { %677 = vmatpush3.bf16.msra.mxu1 %v752_v32  ;;  %v67_v47 = vpack.c.bf16 %v591_v45, %v591_v45  ;;  %v71_v48 = vmul.f32 %v591_v45, %v69_v44 }
  0x48   :  { %68 = vst [vmem:[#allocation2 + $0xc] sm:$0xf] %v67_v47  ;;  %v73_v49 = vsub.f32 %v71_v48, %v72_v46 }
  0x4a   :  { %v74_v50 = vpack.c.bf16 %v73_v49, %v73_v49 }
  0x4c   :  { %v771_v51 = vpop.eup %770  ;;  %75 = vst [vmem:[#allocation2 + $0x10] sm:$0xf] %v74_v50 }
  0x4d   :  { %v53_v52 = vmul.f32 %v771_v51, %v46_v33  ;;  %v638_v33 = vld [vmem:[%s935_s3] ss:$0 sm:$0xff] }
  0x4f   :  { %v54_v53 = vpack.c.bf16 %v53_v52, %v53_v52  ;;  %v77_v54 = vld [vmem:[#allocation2 + $0x8] sm:$0xff] }
  0x50   :  { %v594_v55 = vcombine.low %v77_v54, %v77_v54  ;;  %v595_v56 = vcombine.high %v77_v54, %v77_v54 }
  0x51   :  { %55 = vst [vmem:[#allocation2] sm:$0xf] %v54_v53 }
  0x52   :  { %489 = vmatprep.mubr.bf16.mxu1 %v595_v56 }
  0x53   :  { %490 = vmatmul.mubr.bf16.vlgmr.msra.gmra.mrb[0].mxu1 %v594_v55  ;;  %v765_v4 = vld [vmem:[#allocation2 + $0x10] ss:$0 sps:$4 sm:$0xff]  }
  0x58   :  { %v76_v57 = vld [vmem:[#allocation2] sm:$0xff] }
  0x59   :  { %v592_v58 = vcombine.low %v76_v57, %v76_v57  ;;  %v593_v59 = vcombine.high %v76_v57, %v76_v57 }
  0x5b   :  { %449 = vmatprep.mubr.bf16.mxu0 %v593_v59 }
  0x5c   :  { %450 = vmatmul.mubr.bf16.vlgmr.msra.gmra.mrb[0].mxu0 %v592_v58 }
  0x5d   :  { %694 = vmatpush3.bf16.msra.mxu0 %v757_v60  ;;  %709 = vmatprep.mubr.msk.bf16.mxu0 %vm856_vm0, %v855_v34 }
  0x5e   :  { %695 = vmatprep.subr.bf16.mxu0 %v855_v34 }
  0x61   :  { %696 = vmatpush3.bf16.msra.mxu0 %v758_v61 }
  0x62   :  { %697 = vmatprep.subr.bf16.mxu0 %v855_v34 }
  0x65   :  { %698 = vmatpush3.bf16.msra.mxu0 %v759_v62 }
  0x66   :  { %699 = vmatprep.subr.bf16.mxu0 %v855_v34 }
  0x69   :  { %700 = vmatpush3.bf16.msra.mxu0 %v760_v63 }
  0x6a   :  { %701 = vmatprep.subr.bf16.mxu0 %v855_v34 }
  0x6d   :  { %702 = vmatpush3.bf16.msra.mxu0 %v761_v0 }
  0x6e   :  { %703 = vmatprep.subr.bf16.mxu0 %v855_v34 }
  0x71   :  { %704 = vmatpush3.bf16.msra.mxu0 %v762_v1 }
  0x72   :  { %705 = vmatprep.subr.bf16.mxu0 %v855_v34 }
  0x75   :  { %706 = vmatpush3.bf16.msra.mxu0 %v763_v2 }
  0x76   :  { %707 = vmatprep.subr.bf16.mxu0 %v855_v34 }
  0x79   :  { %708 = vmatpush3.bf16.msra.mxu0 %v764_v3 }
  0x7c   :  { %710 = vmatmul.mubr.bf16.vlgmr.msra.gmra.mrb[4].mxu0 %v765_v4 }
 0x126   :  { %v678_v5 = vpop.f32.mrb[0].mxu1 }
 0x127   :  { %v679_v6 = vpop.f32.mrb[1].mxu1 }
 0x128   :  { %v680_v7 = vadd.f32 %v679_v6, %v678_v5  ;;  %v681_v8 = vpop.f32.mrb[2].mxu1 }
 0x129   :  { %v682_v9 = vpop.f32.mrb[3].mxu1 }
 0x12f   :  { %v656_v10 = vpop.f32.mrb[0].mxu0 }
 0x130   :  { %v657_v11 = vpop.f32.mrb[1].mxu0 }
 0x131   :  { %v658_v12 = vadd.f32 %v657_v11, %v656_v10  ;;  %v659_v13 = vpop.f32.mrb[2].mxu0 }
 0x132   :  { %v660_v14 = vpop.f32.mrb[3].mxu0 }
 0x133   :  { %v492_v15 = vadd.f32 %v680_v7, %v658_v12 }
 0x14f   :  { %v531_v16 = vpop.f32.mrb[4].mxu0 }
 0x150   :  { %v532_v17 = vadd.f32 %v531_v16, %v492_v15  ;;  %v711_v18 = vpop.f32.mrb[5].mxu0 }
 0x151   :  { %v534_v19 = vpop.f32.mrb[6].mxu0 }
 0x152   :  { %v712_v20 = vpop.f32.mrb[7].mxu0  ;;  %537 = vadd.xlane.f32.xlu0 %v532_v17  ;;  %v539_v21 = vmul.f32 %v532_v17, %v532_v17 }
 0x156   :  { %540 = vadd.xlane.f32.xlu0 %v539_v21 }
 0x1df   :  { %v538_v22 = vpop.xlane.xlu0 %537 }
 0x1e0   :  { %v542_v23 = vmul.f32 0.03125, %v538_v22 }
 0x1e2   :  { %v544_v25 = vmul.f32 %v542_v23, %v542_v23  ;;  %v546_v29 = vsub.f32 %v532_v17, %v542_v23 }
 0x1e3   :  { %v541_v24 = vpop.xlane.xlu0 %540 }
 0x1e4   :  { %v543_v26 = vmul.f32 0.03125, %v541_v24 }
 0x1e6   :  { %v545_v27 = vsub.f32 %v543_v26, %v544_v25 }
 0x1e8   :  { %v547_v28 = vadd.f32 1e-05, %v545_v27 }
 0x1ea   :  { %772 = vrsqrt.f32 %v547_v28 }
 0x1f4   :  { %v773_v30 = vpop.eup %772 }
 0x1f5   :  { %v549_v32 = vmul.f32 %v773_v30, %v546_v29 }
 0x1f7   :  { %v557_v34 = vmul.f32 %v637_v31, %v549_v32 }
 0x1f9   :  { %v565_v35 = vadd.f32 %v638_v33, %v557_v34 }
 0x1fb   :  { %v639_v36 = vmul.f32 -1.442695, %v565_v35 }
 0x1fd   :  { %774 = vpow2.f32 %v639_v36 }
 0x207   :  { %v775_v37 = vpop.eup %774 }
 0x208   :  { %v569_v38 = vadd.f32 1.0, %v775_v37 }
 0x20a   :  { %776 = vrcp.f32 %v569_v38 }
 0x214   :  { %v777_v39 = vpop.eup %776 }
 0x215   :  { %v572_v40 = vmul.f32 %v777_v39, %v565_v35 }
 0x217   :  { %573 = vst [vmem:[#allocation8] sm:$0xff] %v572_v40 }
 0x218   :  { %833 = shalt.err (!%p830_p6)
}
 0x219   :  { %s834_s20 = scalar_lea.hbm %s936_s4, 128 }
 0x21a   :  { %p835_p7 = scmp.ne.s32.totalorder %s936_s4, %s834_s20  ;;  %p838_p8 = scmp.lt.u32.totalorder %s834_s20, %s936_s4 }
 0x21c   :  { %p840_p9 = pnand %p838_p8, %p835_p7 }
 0x21e   :  { %843 = shalt.err (!%p840_p9)
}
 0x21f   :  { %583 = dma.vmem_to_hbm [thread:$0]  %s581_s18, 128, %s936_s4, [#allocation5]  }
 0x220   :  { %848 = dma.done.wait [#allocation5], 128  }
 0x221   :  { %849 = vsyncadd [#allocation5], 4294967168 }
 0x222   :  { %587 = vsyncpa [#allocation4], 1 }
 0x223   :  { %588 = vsyncpa [#allocation7], 1 }
 0x224   :  { %589 = vsyncpa [#allocation5], 1 }

</bundles_post_ra>
